<compile_context>
chip_gen: v7x
topology: tpu7x:2x2x1
jax: 0.10.0
libtpu: 0.0.40
codegen_flags: <defaults>
</compile_context>

<pallas_src>
import jax
import jax.numpy as jnp
from jax.experimental import pallas as pl
from jax.experimental.pallas import tpu as pltpu

IN_FEATURES = 7   # 3 (one-hot house type) + 1 (area) + 3 (one-hot location)
OUT_FEATURES = 1
LANE = 128
MAX_TILE = 128 * 1024               # 131072 lanes / grid step (see VMEM math above)
VMEM_LIMIT_BYTES = 32 * 1024 * 1024  # raise v5e's 16 MiB scoped default; safe on v6e/v7x


def _round_up(a: int, b: int) -> int:
    return (a + b - 1) // b * b


def linear_kernel(x_ref, w_ref, b_ref, o_ref):
    # x_ref: (F, TM) f32 VMEM — features on sublanes, batch lane-dense
    # w_ref: (F, 1)  f32 VMEM — weight column, lane-broadcast against x
    # b_ref: (1, 1)  f32 SMEM — scalar bias
    # o_ref: (1, TM) f32 VMEM — lane-dense output tile (unmasked vst)
    prod = x_ref[...] * w_ref[...]                                    # VPU, full tile
    o_ref[...] = jnp.sum(prod, axis=0, keepdims=True) + b_ref[0, 0]   # XLU sublane reduce


def _pick_tile(n_pad: int, max_tile: int) -> int:
    # Tiny batches: single grid step sized exactly to the padded batch.
    if n_pad <= 2 * LANE:
        return n_pad
    # Otherwise: at least two grid steps (so v7x's two TensorCores both get
    # work via the "parallel" batch axis), capped so double-buffered VMEM
    # stays within the scoped limit on every generation.
    half = _round_up((n_pad + 1) // 2, LANE)
    return min(max_tile, half)


def linear_forward(x, weight, bias, *, feature_major=False, max_tile=MAX_TILE):
    """nn.Linear(7, 1) forward: y = x @ W^T + b.

    x: (N, 7) f32 (PyTorch layout), or (7, N) if feature_major=True (preferred —
       skips the transpose copy over HBM).
    weight: (1, 7) f32 (PyTorch layout);  bias: (1,) f32.
    Returns (N, 1) f32.
    """
    if feature_major:
        f, n = x.shape
        x_t = x
    else:
        n, f = x.shape
        # TODO(synk): produce x feature-major upstream to avoid this transpose pass.
        x_t = x.T
    assert f == IN_FEATURES
    assert weight.shape == (OUT_FEATURES, IN_FEATURES) and bias.shape == (OUT_FEATURES,)

    # Pad batch only to the 128-lane granule; the ragged last tile (if any) is
    # handled by the cdiv grid + Pallas OOB read/write masking.
    n_pad = max(_round_up(n, LANE), LANE)
    x_t = x_t.astype(jnp.float32)
    if n_pad != n:
        x_t = jnp.pad(x_t, ((0, 0), (0, n_pad - n)))

    tm = _pick_tile(n_pad, max_tile)
    assert tm % LANE == 0, "tile must stay a multiple of 128 lanes (unmasked vst)"
    num_tiles = pl.cdiv(n_pad, tm)

    w_col = weight.astype(jnp.float32).reshape(IN_FEATURES, OUT_FEATURES)  # (7, 1) VMEM
    b_smem = bias.astype(jnp.float32).reshape(1, 1)                        # (1, 1) SMEM

    out = pl.pallas_call(
        linear_kernel,
        out_shape=jax.ShapeDtypeStruct((1, n_pad), jnp.float32),
        grid_spec=pltpu.PrefetchScalarGridSpec(
            num_scalar_prefetch=0,
            grid=(num_tiles,),
            in_specs=[
                pl.BlockSpec((IN_FEATURES, tm), lambda i: (0, i)),
                pl.BlockSpec((IN_FEATURES, OUT_FEATURES), lambda i: (0, 0)),
                pl.BlockSpec(memory_space=pltpu.MemorySpace.SMEM),
            ],
            out_specs=pl.BlockSpec((1, tm), lambda i: (0, i)),
        ),
        compiler_params=pltpu.CompilerParams(
            dimension_semantics=("parallel",),
            vmem_limit_bytes=VMEM_LIMIT_BYTES),
        cost_estimate=pl.CostEstimate(
            flops=2 * n_pad * IN_FEATURES,
            transcendentals=0,
            bytes_accessed=(n_pad * IN_FEATURES * 4          # x
                            + IN_FEATURES * 4 + 4            # weight + bias
                            + n_pad * 4)),                   # output
    )(x_t, w_col, b_smem)

    # Back to the PyTorch (N, 1) layout.
    # TODO(synk): let downstream consume the lane-dense (1, N) slab directly to
    # skip this small slice/reshape pass.
    return out[0, :n].reshape(n, OUT_FEATURES)


if __name__ == "__main__":
    key = jax.random.PRNGKey(0)
    kw, kb, kx = jax.random.split(key, 3)

    # Deterministic parameter init mimicking nn.Linear's uniform(-1/sqrt(F), 1/sqrt(F)).
    bound = 1.0 / jnp.sqrt(jnp.float32(IN_FEATURES))
    weight = jax.random.uniform(kw, (OUT_FEATURES, IN_FEATURES),
                                dtype=jnp.float32, minval=-bound, maxval=bound)
    bias = jax.random.uniform(kb, (OUT_FEATURES,),
                              dtype=jnp.float32, minval=-bound, maxval=bound)

    # Example input matching the module's feature construction:
    # [one-hot(3) house type | area | one-hot(3) location], batch = 2.
    x_small = jnp.array(
        [[1.0, 0.0, 0.0, 85.0, 0.0, 1.0, 0.0],
         [0.0, 1.0, 0.0, 100.0, 1.0, 0.0, 0.0]],
        dtype=jnp.float32,
    )
    out_small = jax.block_until_ready(linear_forward(x_small, weight, bias))
    ref_small = x_small @ weight.T + bias
    assert out_small.shape == (2, 1)
    assert jnp.allclose(out_small, ref_small, atol=1e-5, rtol=1e-5)

    # Slightly larger batch to exercise the multi-step grid + ragged last tile.
    x_big = jax.random.uniform(kx, (384, IN_FEATURES), dtype=jnp.float32,
                               minval=0.0, maxval=100.0)
    out_big = jax.block_until_ready(linear_forward(x_big, weight, bias))
    ref_big = x_big @ weight.T + bias
    assert out_big.shape == (384, 1)
    assert jnp.allclose(out_big, ref_big, atol=1e-4, rtol=1e-5)

    print("KERNEL_OK")
</pallas_src>

<mosaic_0001>
module attributes {stable_mosaic.version = 11 : i64} {
  func.func @linear_kernel(%arg0: i32, %arg1: memref<7x128xf32, #tpu.memory_space<vmem>>, %arg2: memref<7x1xf32, #tpu.memory_space<vmem>>, %arg3: memref<1x1xf32, #tpu.memory_space<smem>>, %arg4: memref<1x128xf32, #tpu.memory_space<vmem>>) attributes {dimension_semantics = [#tpu.dimension_semantics<parallel>], iteration_bounds = array<i64: 1>, scalar_prefetch = 0 : i64, scratch_operands = 0 : i64, tpu.core_type = #tpu.core_type<tc>, window_params = [{transform_indices = @transform_0, window_bounds = array<i64: 7, 128>}, {pipeline_mode = #tpu.pipeline_mode<synchronous>, transform_indices = @transform_1, window_bounds = array<i64: 7, 1>}, {transform_indices = @transform_2, window_bounds = array<i64: 1, 1>}, {transform_indices = @transform_3, window_bounds = array<i64: 1, 128>}]} {
    %c0 = arith.constant 0 : index
    %c0_0 = arith.constant 0 : index
    %0 = vector.load %arg1[%c0, %c0_0] : memref<7x128xf32, #tpu.memory_space<vmem>>, vector<7x128xf32>
    %c0_1 = arith.constant 0 : index
    %c0_2 = arith.constant 0 : index
    %1 = vector.load %arg2[%c0_1, %c0_2] : memref<7x1xf32, #tpu.memory_space<vmem>>, vector<7x1xf32>
    %2 = vector.broadcast %1 : vector<7x1xf32> to vector<7x128xf32>
    %3 = arith.mulf %0, %2 : vector<7x128xf32>
    %cst = arith.constant dense<0.000000e+00> : vector<128xf32>
    %4 = vector.multi_reduction <add>, %3, %cst [0] : vector<7x128xf32> to vector<128xf32>
    %5 = vector.shape_cast %4 : vector<128xf32> to vector<1x128xf32>
    %c0_3 = arith.constant 0 : index
    %c0_4 = arith.constant 0 : index
    %6 = memref.load %arg3[%c0_3, %c0_4] : memref<1x1xf32, #tpu.memory_space<smem>>
    %7 = vector.broadcast %6 : f32 to vector<1x128xf32>
    %8 = arith.addf %5, %7 : vector<1x128xf32>
    %c0_5 = arith.constant 0 : index
    %c0_6 = arith.constant 0 : index
    %9 = vector.load %arg4[%c0_5, %c0_6] : memref<1x128xf32, #tpu.memory_space<vmem>>, vector<1x128xf32>
    tpu.vector_store %arg4[%c0_5, %c0_6], %8 {strides = array<i32>} : memref<1x128xf32, #tpu.memory_space<vmem>>, vector<1x128xf32>,
    return
  }
  func.func @transform_0(%arg0: i32) -> (i32, i32) {
    %c0_i32 = arith.constant 0 : i32
    %c0_i32_0 = arith.constant 0 : i32
    return %c0_i32, %arg0 : i32, i32
  }
  func.func @transform_1(%arg0: i32) -> (i32, i32) {
    %c0_i32 = arith.constant 0 : i32
    %c0_i32_0 = arith.constant 0 : i32
    %c0_i32_1 = arith.constant 0 : i32
    return %c0_i32, %c0_i32_0 : i32, i32
  }
  func.func @transform_2(%arg0: i32) -> (i32, i32) {
    %c0_i32 = arith.constant 0 : i32
    %c0_i32_0 = arith.constant 0 : i32
    %c0_i32_1 = arith.constant 0 : i32
    return %c0_i32, %c0_i32_0 : i32, i32
  }
  func.func @transform_3(%arg0: i32) -> (i32, i32) {
    %c0_i32 = arith.constant 0 : i32
    %c0_i32_0 = arith.constant 0 : i32
    return %c0_i32, %arg0 : i32, i32
  }
}

</mosaic_0001>

<bundles_post_ra>
// kernel: tpu_custom_call.1
= control target key start
LH: loop header
LB: loop body
LE: loop exit
PB: predicated region body
PF: predicated region fallthrough
CT: control target
= control target key end

     0   :  { %s120_s0 = inlined_call_operand.vmem [shape: f32[7,128], index: 0, kind: input, shape index: {}]   ;;  %s121_s1 = inlined_call_operand.vmem [shape: f32[7,1], index: 1, kind: input, shape index: {}]   ;;  %s122_s2 = inlined_call_operand.<no memory space> [shape: f32[1,1], index: 2, kind: input, shape index: {}]   ;;  %s123_s3 = inlined_call_operand.hbm [shape: f32[1,128], index: 3, kind: output, shape index: {}]  }
   0x1   :  { %v17_v0 = vld [vmem:[%s121_s1] sm:$0x7f] }
   0x2   :  { %9 = vsyncpa [#allocation4], 0  ;;  %v77_v1 = vmov 0   ;;  %v16_v2 = vld [vmem:[%s120_s0] sm:$0x7f]  ;;  %vm24_vm0 = vcmask 1046528   ;;  %v33_v11 = vstv %s122_s2 }
   0x3   :  { %52 = vset.pattern.permute.xlu0 %v77_v1  ;;  %s78_s1 = smov [#allocation3]  }
   0x4   :  { %20 = vperm.xlu0 %52, %v17_v0   ;;  %s42_s18 = sshll.u32 %s78_s1, 4  ;;  %s43_s18 = int_to_ptr.vmem [resolvable:$true] %s42_s18 }
   0x5   :  { %s53_s0 = scalar_lea.vmem %s43_s18, 16  ;;  %s57_s19 = scalar_lea.vmem %s43_s18, 32 }
   0x6   :  { %p54_p0 = scmp.ne.s32.totalorder %s43_s18, %s53_s0  ;;  %p58_p1 = scmp.lt.s32.totalorder %s43_s18, %s43_s18 }
   0x7   :  { %p59_p2 = scmp.lt.s32.totalorder %s57_s19, %s53_s0 }
   0x9   :  { %p60_p3 = por %p59_p2, %p58_p1 }
   0xb   :  { %p61_p4 = pnand %p60_p3, %p54_p0 }
  0x83   :  { %v21_v3 = vpop.permute.xlu0 %20 }
  0x84   :  { %v23_v4 = vmul.f32 %v21_v3, %v16_v2 }
  0x86   :  { %v25_v5 = vsel %vm24_vm0, %v23_v4, 0.0 }
  0x87   :  { %v26_v6 = vrot.slane %v25_v5, 4 }
  0x89   :  { %v27_v7 = vadd.f32 %v26_v6, %v25_v5 }
  0x8b   :  { %v28_v8 = vrot.slane %v27_v7, 2 }
  0x8d   :  { %v29_v9 = vadd.f32 %v28_v8, %v27_v7 }
  0x8f   :  { %v30_v10 = vrot.slane %v29_v9, 1 }
  0x91   :  { %v31_v12 = vadd.f32 %v30_v10, %v29_v9 }
  0x93   :  { %v34_v13 = vadd.f32 %v33_v11, %v31_v12 }
  0x95   :  { %35 = vst [vmem:[#allocation3] sm:$0x1] %v34_v13 }
  0x96   :  { %64 = shalt.err (!%p61_p4)
}
  0x97   :  { %s65_s22 = scalar_lea.hbm %s123_s3, 16 }
  0x98   :  { %p66_p5 = scmp.ne.s32.totalorder %s123_s3, %s65_s22  ;;  %p69_p6 = scmp.lt.u32.totalorder %s65_s22, %s123_s3 }
  0x9a   :  { %p71_p7 = pnand %p69_p6, %p66_p5 }
  0x9c   :  { %74 = shalt.err (!%p71_p7)
}
  0x9d   :  { %45 = dma.vmem_to_hbm [thread:$0]  %s43_s18, 16, %s123_s3, [#allocation4]  }
  0x9e   :  { %75 = dma.done.wait [#allocation4], 16  }
  0x9f   :  { %76 = vsyncadd [#allocation4], 4294967280 }
  0xa0   :  { %49 = vsyncpa [#allocation4], 1 }

</bundles_post_ra>
